<compile_context>
chip_gen: v7x
topology: tpu7x:2x2x1
jax: 0.10.0
libtpu: 0.0.40
codegen_flags: <defaults>
</compile_context>

<pallas_src>
import functools

import jax
import jax.numpy as jnp
from jax.experimental import pallas as pl
from jax.experimental.pallas import tpu as pltpu


def _round_up(v, m):
    return ((v + m - 1) // m) * m


def _num_tensorcores():
    # Split the node reduction across TensorCores only on 2-TC chips (v7x).
    try:
        kind = jax.devices()[0].device_kind.lower()
    except Exception:
        return 1
    return 2 if "v7" in kind else 1


def _vmem_capacity_bytes():
    try:
        return int(pltpu.get_tpu_info().vmem_capacity_bytes)
    except Exception:
        return 64 * 1024 * 1024  # conservative fallback (v7x physical VMEM)


def _attention_pool_kernel(x_ref, w1_ref, b1_ref, w2_ref, b2_ref,
                           acc_out_ref, m_out_ref, l_out_ref,
                           m_ref, l_ref, acc_ref,
                           *, n_rows, block_n, split_rows, needs_mask, matmul_dtype):
    c = pl.program_id(0)          # node-range split (parallel axis, megacore)
    i = pl.program_id(1)          # tile within this split (reduction axis)

    # --- init running softmax state on the first tile of this split ------------
    @pl.when(i == 0)
    def _init():
        m_ref[...] = jnp.full_like(m_ref, -jnp.inf)
        l_ref[...] = jnp.zeros_like(l_ref)
        acc_ref[...] = jnp.zeros_like(acc_ref)

    x = x_ref[...]                                                   # (TN, D), padded rows are zeros

    # Linear(input_dim -> hidden) + tanh : bf16 MXU matmul, f32 accumulate, EUP tanh
    h = jnp.tanh(
        jnp.dot(x.astype(matmul_dtype), w1_ref[...],
                preferred_element_type=jnp.float32)
        + b1_ref[...]                                                # (1, H) broadcast
    )                                                                # (TN, H) f32

    # Linear(hidden -> 1) as VPU multiply + lane reduce (avoids a 1-lane MXU matmul)
    s = jnp.sum(h * w2_ref[...], axis=-1, keepdims=True) + b2_ref[0, 0]   # (TN, 1)

    if needs_mask:
        # Only a cheap (TN, 1) mask on the scores: x itself is zero-padded in the
        # wrapper so the pooled sum needs no (TN, D) masking.
        row = (jax.lax.broadcasted_iota(jnp.int32, (block_n, 1), 0)
               + c * split_rows + i * block_n)
        s = jnp.where(row < n_rows, s, -jnp.inf)

    # --- online softmax update --------------------------------------------------
    m_prev = m_ref[...]                                              # (1, 1)
    m_new = jnp.maximum(m_prev, jnp.max(s, axis=0, keepdims=True))   # (1, 1)
    # Defensive: if everything seen so far is masked (m_new == -inf), use a finite
    # stand-in so exp() cannot produce NaN; alpha/e then come out as 0 and the
    # running state stays zero, which the combine epilogue handles.
    m_safe = jnp.where(m_new == -jnp.inf, jnp.zeros_like(m_new), m_new)
    alpha = jnp.exp(m_prev - m_safe)                                 # rescale old state
    e = jnp.exp(s - m_safe)                                          # (TN, 1); masked rows -> 0

    l_ref[...] = alpha * l_ref[...] + jnp.sum(e, axis=0, keepdims=True)
    acc_ref[...] = alpha * acc_ref[...] + jnp.sum(
        x.astype(jnp.float32) * e, axis=0, keepdims=True)            # (1, D) f32
    m_ref[...] = m_new

    # --- finalize: write this split's partial softmax state ---------------------
    @pl.when(i == pl.num_programs(1) - 1)
    def _finalize():
        acc_out_ref[0, :, :] = acc_ref[...]
        m_out_ref[0, :, :] = m_ref[...]
        l_out_ref[0, :, :] = l_ref[...]


def attention_pooling(x, w1, b1, w2, b2, *, block_n=None, num_splits=None,
                      matmul_dtype=jnp.bfloat16):
    """x: (N, D); w1: (D, H); b1: (1,H)/(H,); w2: (H,1)/(H,); b2: (1,1)/(1,)/scalar.

    Returns (1, D), matching AttentionPooling.forward(x, batch=None).
    """
    N, D = x.shape
    H = w1.shape[1]
    out_dtype = x.dtype

    if matmul_dtype is None:
        matmul_dtype = x.dtype
    x_isz = jnp.dtype(x.dtype).itemsize
    mm_isz = jnp.dtype(matmul_dtype).itemsize
    sublane = 8 * max(1, 4 // x_isz)          # 8 for f32, 16 for bf16, 32 for int8/fp8

    # How many TensorCore splits of the node range (v7x only by default).
    if num_splits is None:
        num_splits = _num_tensorcores() if N >= 4096 else 1
    num_splits = max(1, min(num_splits, pl.cdiv(N, sublane)))

    rows_per_split = pl.cdiv(N, num_splits)

    # Generation-aware VMEM budget (v7x: 64 MiB physical, v5e/v6e: 128 MiB).
    vmem_cap = _vmem_capacity_bytes()
    vmem_limit = int(min(0.75 * vmem_cap, vmem_cap - (8 << 20)))

    if block_n is None:
        # Per-row VMEM estimate: double-buffered x tile + bf16 cast copy for the MXU
        # + f32 copy for the pooled sum + f32 h temporary (+ slack).
        bytes_per_row = 2 * D * x_isz + D * mm_isz + 4 * D + 4 * H + 64
        fixed_bytes = 2 * (D * H * mm_isz + 2 * 4 * H) + 8 * D + (512 << 10)
        cap_rows = (int(0.6 * vmem_limit) - fixed_bytes) // bytes_per_row
        cap_rows = max(sublane, min(16384, cap_rows))
        cap_rows = (cap_rows // sublane) * sublane
        block_n = min(_round_up(rows_per_split, sublane), cap_rows)
    else:
        block_n = _round_up(block_n, sublane)

    tiles_per_split = pl.cdiv(rows_per_split, block_n)
    split_rows = tiles_per_split * block_n
    padded_n = num_splits * split_rows
    needs_mask = padded_n != N
    if padded_n != N:
        # Zero-pad so every tile is full; padded rows are neutralized by the cheap
        # -inf score mask (and contribute 0 to the pooled sum since x is zero there).
        x = jnp.pad(x, ((0, padded_n - N), (0, 0)))

    w1_mm = jnp.asarray(w1, dtype=matmul_dtype)                 # resident MXU copy (bf16 halves DMA)
    b1_row = jnp.asarray(b1, dtype=jnp.float32).reshape(1, H)
    w2_row = jnp.asarray(w2, dtype=jnp.float32).reshape(1, H)   # (H,1) -> (1,H)
    b2_s = jnp.asarray(b2, dtype=jnp.float32).reshape(1, 1)

    kernel = functools.partial(
        _attention_pool_kernel,
        n_rows=N, block_n=block_n, split_rows=split_rows,
        needs_mask=needs_mask, matmul_dtype=matmul_dtype)

    acc_p, m_p, l_p = pl.pallas_call(
        kernel,
        out_shape=(
            jax.ShapeDtypeStruct((num_splits, 1, D), jnp.float32),   # partial weighted sums
            jax.ShapeDtypeStruct((num_splits, 1, 1), jnp.float32),   # partial running max
            jax.ShapeDtypeStruct((num_splits, 1, 1), jnp.float32),   # partial denominators
        ),
        grid=(num_splits, tiles_per_split),
        in_specs=[
            pl.BlockSpec((block_n, D), lambda c, i: (c * tiles_per_split + i, 0)),  # x streamed
            pl.BlockSpec((D, H), lambda c, i: (0, 0)),               # w1 resident
            pl.BlockSpec((1, H), lambda c, i: (0, 0)),               # b1 resident
            pl.BlockSpec((1, H), lambda c, i: (0, 0)),               # w2 (row) resident
            pl.BlockSpec(memory_space=pltpu.MemorySpace.SMEM),       # b2 scalar in SMEM
        ],
        out_specs=(
            pl.BlockSpec((1, 1, D), lambda c, i: (c, 0, 0)),
            pl.BlockSpec((1, 1, 1), lambda c, i: (c, 0, 0)),
            pl.BlockSpec((1, 1, 1), lambda c, i: (c, 0, 0)),
        ),
        scratch_shapes=[
            pltpu.VMEM((1, 1), jnp.float32),   # running max m
            pltpu.VMEM((1, 1), jnp.float32),   # running denominator l
            pltpu.VMEM((1, D), jnp.float32),   # running weighted sum
        ],
        compiler_params=pltpu.CompilerParams(
            dimension_semantics=("parallel", "arbitrary"),
            vmem_limit_bytes=vmem_limit),
    )(x, w1_mm, b1_row, w2_row, b2_s)

    # Combine the per-split partial softmax states (trivial O(num_splits*D) epilogue).
    m_p = m_p[:, 0, :]                                   # (S, 1)
    l_p = l_p[:, 0, :]                                   # (S, 1)
    acc_p = acc_p[:, 0, :]                               # (S, D)
    m_g = jnp.max(m_p, axis=0, keepdims=True)            # (1, 1)
    scale = jnp.exp(m_p - m_g)                           # empty splits (m=-inf) -> 0
    l_g = jnp.sum(l_p * scale, axis=0, keepdims=True)    # (1, 1)
    acc_g = jnp.sum(acc_p * scale, axis=0, keepdims=True)
    return (acc_g / l_g).astype(out_dtype)               # (1, D)


def reference_attention_pooling(x, w1, b1, w2, b2):
    """Pure-JAX f32 reference matching the PyTorch forward (batch=None)."""
    h = jnp.tanh(x @ w1 + b1)
    s = h @ w2 + b2
    wts = jax.nn.softmax(s, axis=0)
    return jnp.sum(x * wts, axis=0, keepdims=True)


if __name__ == "__main__":
    input_dim = 32
    hidden_dim = 128   # module default

    key = jax.random.PRNGKey(0)
    kx, k1, k2, k3, k4, kx2 = jax.random.split(key, 6)

    # Deterministic parameter init (PyTorch-Linear-style uniform fan-in scaling)
    bound1 = 1.0 / (input_dim ** 0.5)
    w1 = jax.random.uniform(k1, (input_dim, hidden_dim), jnp.float32, -bound1, bound1)
    b1 = jax.random.uniform(k2, (1, hidden_dim), jnp.float32, -bound1, bound1)
    bound2 = 1.0 / (hidden_dim ** 0.5)
    w2 = jax.random.uniform(k3, (hidden_dim, 1), jnp.float32, -bound2, bound2)
    b2 = jax.random.uniform(k4, (1, 1), jnp.float32, -bound2, bound2)

    x_small = jax.random.normal(kx, (8, input_dim), dtype=jnp.float32)
    x_big = jax.random.normal(kx2, (1037, input_dim), dtype=jnp.float32)

    ref_small = reference_attention_pooling(x_small, w1, b1, w2, b2)
    ref_big = reference_attention_pooling(x_big, w1, b1, w2, b2)

    # Case 1: tiny graph, defaults (single tile, bf16 MXU matmul).
    out_small = jax.block_until_ready(attention_pooling(x_small, w1, b1, w2, b2))
    assert out_small.shape == (1, input_dim), out_small.shape
    assert jnp.allclose(out_small, ref_small, atol=1e-2, rtol=1e-2), (out_small, ref_small)

    # Case 1b: same, f32 matmul — tight structural check against the f32 reference.
    out_small_f32 = jax.block_until_ready(
        attention_pooling(x_small, w1, b1, w2, b2, matmul_dtype=jnp.float32))
    assert jnp.allclose(out_small_f32, ref_small, atol=1e-4, rtol=1e-4), (out_small_f32, ref_small)

    # Case 2: larger node count, defaults (single big VMEM-sized tile, padded tail).
    out_big = jax.block_until_ready(attention_pooling(x_big, w1, b1, w2, b2))
    assert out_big.shape == (1, input_dim), out_big.shape
    assert jnp.allclose(out_big, ref_big, atol=1e-2, rtol=1e-2), (out_big, ref_big)

    # Case 2b: force the tiled online-softmax + two-split combine path (works on any
    # chip; megacore-parallel on v7x), f32 matmul for a tight check.
    out_big_split = jax.block_until_ready(
        attention_pooling(x_big, w1, b1, w2, b2, block_n=128, num_splits=2,
                          matmul_dtype=jnp.float32))
    assert jnp.allclose(out_big_split, ref_big, atol=1e-4, rtol=1e-4), (out_big_split, ref_big)

    # Case 2c: tiled + two-split with the default bf16 matmul.
    out_big_split_bf = jax.block_until_ready(
        attention_pooling(x_big, w1, b1, w2, b2, block_n=128, num_splits=2))
    assert jnp.allclose(out_big_split_bf, ref_big, atol=1e-2, rtol=1e-2), (out_big_split_bf, ref_big)

    print("KERNEL_OK")
</pallas_src>

<mosaic_0001>
module attributes {stable_mosaic.version = 11 : i64} {
  func.func @_attention_pool_kernel(%arg0: i32, %arg1: i32, %arg2: memref<8x32xf32, #tpu.memory_space<vmem>>, %arg3: memref<32x128xbf16, #tpu.memory_space<vmem>>, %arg4: memref<1x128xf32, #tpu.memory_space<vmem>>, %arg5: memref<1x128xf32, #tpu.memory_space<vmem>>, %arg6: memref<1x1xf32, #tpu.memory_space<smem>>, %arg7: memref<1x1x32xf32, #tpu.memory_space<vmem>>, %arg8: memref<1x1x1xf32, #tpu.memory_space<vmem>>, %arg9: memref<1x1x1xf32, #tpu.memory_space<vmem>>, %arg10: memref<1x1xf32, #tpu.memory_space<vmem>>, %arg11: memref<1x1xf32, #tpu.memory_space<vmem>>, %arg12: memref<1x32xf32, #tpu.memory_space<vmem>>) attributes {dimension_semantics = [#tpu.dimension_semantics<parallel>, #tpu.dimension_semantics<arbitrary>], iteration_bounds = array<i64: 1, 1>, scalar_prefetch = 0 : i64, scratch_operands = 3 : i64, tpu.core_type = #tpu.core_type<tc>, window_params = [{transform_indices = @transform_0, window_bounds = array<i64: 8, 32>}, {pipeline_mode = #tpu.pipeline_mode<synchronous>, transform_indices = @transform_1, window_bounds = array<i64: 32, 128>}, {pipeline_mode = #tpu.pipeline_mode<synchronous>, transform_indices = @transform_2, window_bounds = array<i64: 1, 128>}, {pipeline_mode = #tpu.pipeline_mode<synchronous>, transform_indices = @transform_3, window_bounds = array<i64: 1, 128>}, {transform_indices = @transform_4, window_bounds = array<i64: 1, 1>}, {transform_indices = @transform_5, window_bounds = array<i64: 1, 1, 32>}, {transform_indices = @transform_6, window_bounds = array<i64: 1, 1, 1>}, {transform_indices = @transform_7, window_bounds = array<i64: 1, 1, 1>}]} {
    %c0_i32 = arith.constant 0 : i32
    %0 = arith.cmpi eq, %arg1, %c0_i32 : i32
    %1 = arith.extui %0 : i1 to i32
    %c0_i32_0 = arith.constant 0 : i32
    %2 = arith.cmpi ne, %1, %c0_i32_0 : i32
    scf.if %2 {
      %cst_30 = arith.constant 0xFF800000 : f32
      %51 = vector.broadcast %cst_30 : f32 to vector<1x1xf32>
      %c0_31 = arith.constant 0 : index
      %c0_32 = arith.constant 0 : index
      %52 = vector.load %arg10[%c0_31, %c0_32] : memref<1x1xf32, #tpu.memory_space<vmem>>, vector<1x1xf32>
      tpu.vector_store %arg10[%c0_31, %c0_32], %51 {strides = array<i32>} : memref<1x1xf32, #tpu.memory_space<vmem>>, vector<1x1xf32>,
      %cst_33 = arith.constant 0.000000e+00 : f32
      %53 = vector.broadcast %cst_33 : f32 to vector<1x1xf32>
      %c0_34 = arith.constant 0 : index
      %c0_35 = arith.constant 0 : index
      %54 = vector.load %arg11[%c0_34, %c0_35] : memref<1x1xf32, #tpu.memory_space<vmem>>, vector<1x1xf32>
      tpu.vector_store %arg11[%c0_34, %c0_35], %53 {strides = array<i32>} : memref<1x1xf32, #tpu.memory_space<vmem>>, vector<1x1xf32>,
      %cst_36 = arith.constant 0.000000e+00 : f32
      %55 = vector.broadcast %cst_36 : f32 to vector<1x32xf32>
      %c0_37 = arith.constant 0 : index
      %c0_38 = arith.constant 0 : index
      %56 = vector.load %arg12[%c0_37, %c0_38] : memref<1x32xf32, #tpu.memory_space<vmem>>, vector<1x32xf32>
      tpu.vector_store %arg12[%c0_37, %c0_38], %55 {strides = array<i32>} : memref<1x32xf32, #tpu.memory_space<vmem>>, vector<1x32xf32>,
    } else {
    }
    %c0 = arith.constant 0 : index
    %c0_1 = arith.constant 0 : index
    %3 = vector.load %arg2[%c0, %c0_1] : memref<8x32xf32, #tpu.memory_space<vmem>>, vector<8x32xf32>
    %4 = arith.truncf %3 : vector<8x32xf32> to vector<8x32xbf16>
    %c0_2 = arith.constant 0 : index
    %c0_3 = arith.constant 0 : index
    %5 = vector.load %arg3[%c0_2, %c0_3] : memref<32x128xbf16, #tpu.memory_space<vmem>>, vector<32x128xbf16>
    %cst = arith.constant dense<0.000000e+00> : vector<8x128xf32>
    %6 = tpu.matmul %4, %5, %cst {dimension_numbers = #tpu.dot_dimension_numbers<[1], [0], [0], [1], [0, 0, 1, 1], [], []>} : vector<8x32xbf16>, vector<32x128xbf16>, vector<8x128xf32> -> vector<8x128xf32>
    %c0_4 = arith.constant 0 : index
    %c0_5 = arith.constant 0 : index
    %7 = vector.load %arg4[%c0_4, %c0_5] : memref<1x128xf32, #tpu.memory_space<vmem>>, vector<1x128xf32>
    %8 = vector.broadcast %7 : vector<1x128xf32> to vector<8x128xf32>
    %9 = arith.addf %6, %8 : vector<8x128xf32>
    %10 = math.tanh %9 : vector<8x128xf32>
    %c0_6 = arith.constant 0 : index
    %c0_7 = arith.constant 0 : index
    %11 = vector.load %arg5[%c0_6, %c0_7] : memref<1x128xf32, #tpu.memory_space<vmem>>, vector<1x128xf32>
    %12 = vector.broadcast %11 : vector<1x128xf32> to vector<8x128xf32>
    %13 = arith.mulf %10, %12 : vector<8x128xf32>
    %cst_8 = arith.constant dense<0.000000e+00> : vector<8xf32>
    %14 = vector.multi_reduction <add>, %13, %cst_8 [1] : vector<8x128xf32> to vector<8xf32>
    %15 = vector.shape_cast %14 : vector<8xf32> to vector<8x1xf32>
    %c0_9 = arith.constant 0 : index
    %c0_10 = arith.constant 0 : index
    %16 = memref.load %arg6[%c0_9, %c0_10] : memref<1x1xf32, #tpu.memory_space<smem>>
    %17 = vector.broadcast %16 : f32 to vector<8x1xf32>
    %18 = arith.addf %15, %17 : vector<8x1xf32>
    %c0_11 = arith.constant 0 : index
    %c0_12 = arith.constant 0 : index
    %19 = vector.load %arg10[%c0_11, %c0_12] : memref<1x1xf32, #tpu.memory_space<vmem>>, vector<1x1xf32>
    %cst_13 = arith.constant dense<0xFF800000> : vector<1xf32>
    %20 = vector.multi_reduction <maximumf>, %18, %cst_13 [0] : vector<8x1xf32> to vector<1xf32>
    %21 = vector.shape_cast %20 : vector<1xf32> to vector<1x1xf32>
    %22 = arith.maximumf %19, %21 : vector<1x1xf32>
    %cst_14 = arith.constant 0xFF800000 : f32
    %23 = vector.broadcast %cst_14 : f32 to vector<1x1xf32>
    %24 = arith.cmpf oeq, %22, %23 : vector<1x1xf32>
    %cst_15 = arith.constant 0.000000e+00 : f32
    %25 = vector.broadcast %cst_15 : f32 to vector<1x1xf32>
    %26 = arith.select %24, %25, %22 : vector<1x1xi1>, vector<1x1xf32>
    %27 = arith.subf %19, %26 : vector<1x1xf32>
    %28 = math.exp %27 : vector<1x1xf32>
    %29 = vector.broadcast %26 : vector<1x1xf32> to vector<8x1xf32>
    %30 = arith.subf %18, %29 : vector<8x1xf32>
    %31 = math.exp %30 : vector<8x1xf32>
    %c0_16 = arith.constant 0 : index
    %c0_17 = arith.constant 0 : index
    %32 = vector.load %arg11[%c0_16, %c0_17] : memref<1x1xf32, #tpu.memory_space<vmem>>, vector<1x1xf32>
    %33 = arith.mulf %28, %32 : vector<1x1xf32>
    %cst_18 = arith.constant dense<0.000000e+00> : vector<1xf32>
    %34 = vector.multi_reduction <add>, %31, %cst_18 [0] : vector<8x1xf32> to vector<1xf32>
    %35 = vector.shape_cast %34 : vector<1xf32> to vector<1x1xf32>
    %36 = arith.addf %33, %35 : vector<1x1xf32>
    %c0_19 = arith.constant 0 : index
    %c0_20 = arith.constant 0 : index
    %37 = vector.load %arg11[%c0_19, %c0_20] : memref<1x1xf32, #tpu.memory_space<vmem>>, vector<1x1xf32>
    tpu.vector_store %arg11[%c0_19, %c0_20], %36 {strides = array<i32>} : memref<1x1xf32, #tpu.memory_space<vmem>>, vector<1x1xf32>,
    %c0_21 = arith.constant 0 : index
    %c0_22 = arith.constant 0 : index
    %38 = vector.load %arg12[%c0_21, %c0_22] : memref<1x32xf32, #tpu.memory_space<vmem>>, vector<1x32xf32>
    %39 = vector.broadcast %28 : vector<1x1xf32> to vector<1x32xf32>
    %40 = arith.mulf %39, %38 : vector<1x32xf32>
    %41 = vector.broadcast %31 : vector<8x1xf32> to vector<8x32xf32>
    %42 = arith.mulf %3, %41 : vector<8x32xf32>
    %cst_23 = arith.constant dense<0.000000e+00> : vector<32xf32>
    %43 = vector.multi_reduction <add>, %42, %cst_23 [0] : vector<8x32xf32> to vector<32xf32>
    %44 = vector.shape_cast %43 : vector<32xf32> to vector<1x32xf32>
    %45 = arith.addf %40, %44 : vector<1x32xf32>
    %c0_24 = arith.constant 0 : index
    %c0_25 = arith.constant 0 : index
    %46 = vector.load %arg12[%c0_24, %c0_25] : memref<1x32xf32, #tpu.memory_space<vmem>>, vector<1x32xf32>
    tpu.vector_store %arg12[%c0_24, %c0_25], %45 {strides = array<i32>} : memref<1x32xf32, #tpu.memory_space<vmem>>, vector<1x32xf32>,
    %c0_26 = arith.constant 0 : index
    %c0_27 = arith.constant 0 : index
    %47 = vector.load %arg10[%c0_26, %c0_27] : memref<1x1xf32, #tpu.memory_space<vmem>>, vector<1x1xf32>
    tpu.vector_store %arg10[%c0_26, %c0_27], %22 {strides = array<i32>} : memref<1x1xf32, #tpu.memory_space<vmem>>, vector<1x1xf32>,
    %c0_i32_28 = arith.constant 0 : i32
    %48 = arith.cmpi eq, %arg1, %c0_i32_28 : i32
    %49 = arith.extui %48 : i1 to i32
    %c0_i32_29 = arith.constant 0 : i32
    %50 = arith.cmpi ne, %49, %c0_i32_29 : i32
    scf.if %50 {
      %c0_30 = arith.constant 0 : index
      %c0_31 = arith.constant 0 : index
      %51 = vector.load %arg12[%c0_30, %c0_31] : memref<1x32xf32, #tpu.memory_space<vmem>>, vector<1x32xf32>
      %c0_32 = arith.constant 0 : index
      %c0_33 = arith.constant 0 : index
      %c0_34 = arith.constant 0 : index
      %52 = vector.load %arg7[%c0_32, %c0_33, %c0_34] : memref<1x1x32xf32, #tpu.memory_space<vmem>>, vector<1x1x32xf32>
      %53 = vector.shape_cast %52 : vector<1x1x32xf32> to vector<1x32xf32>
      %54 = vector.shape_cast %51 : vector<1x32xf32> to vector<1x1x32xf32>
      tpu.vector_store %arg7[%c0_32, %c0_33, %c0_34], %54 {strides = array<i32>} : memref<1x1x32xf32, #tpu.memory_space<vmem>>, vector<1x1x32xf32>,
      %c0_35 = arith.constant 0 : index
      %c0_36 = arith.constant 0 : index
      %55 = vector.load %arg10[%c0_35, %c0_36] : memref<1x1xf32, #tpu.memory_space<vmem>>, vector<1x1xf32>
      %c0_37 = arith.constant 0 : index
      %c0_38 = arith.constant 0 : index
      %c0_39 = arith.constant 0 : index
      %56 = vector.load %arg8[%c0_37, %c0_38, %c0_39] : memref<1x1x1xf32, #tpu.memory_space<vmem>>, vector<1x1x1xf32>
      %57 = vector.shape_cast %56 : vector<1x1x1xf32> to vector<1x1xf32>
      %58 = vector.shape_cast %55 : vector<1x1xf32> to vector<1x1x1xf32>
      tpu.vector_store %arg8[%c0_37, %c0_38, %c0_39], %58 {strides = array<i32>} : memref<1x1x1xf32, #tpu.memory_space<vmem>>, vector<1x1x1xf32>,
      %c0_40 = arith.constant 0 : index
      %c0_41 = arith.constant 0 : index
      %59 = vector.load %arg11[%c0_40, %c0_41] : memref<1x1xf32, #tpu.memory_space<vmem>>, vector<1x1xf32>
      %c0_42 = arith.constant 0 : index
      %c0_43 = arith.constant 0 : index
      %c0_44 = arith.constant 0 : index
      %60 = vector.load %arg9[%c0_42, %c0_43, %c0_44] : memref<1x1x1xf32, #tpu.memory_space<vmem>>, vector<1x1x1xf32>
      %61 = vector.shape_cast %60 : vector<1x1x1xf32> to vector<1x1xf32>
      %62 = vector.shape_cast %59 : vector<1x1xf32> to vector<1x1x1xf32>
      tpu.vector_store %arg9[%c0_42, %c0_43, %c0_44], %62 {strides = array<i32>} : memref<1x1x1xf32, #tpu.memory_space<vmem>>, vector<1x1x1xf32>,
    } else {
    }
    return
  }
  func.func @transform_0(%arg0: i32, %arg1: i32) -> (i32, i32) {
    %c1_i32 = arith.constant 1 : i32
    %0 = arith.muli %arg0, %c1_i32 : i32
    %1 = arith.addi %0, %arg1 : i32
    %c0_i32 = arith.constant 0 : i32
    %c0_i32_0 = arith.constant 0 : i32
    return %1, %c0_i32 : i32, i32
  }
  func.func @transform_1(%arg0: i32, %arg1: i32) -> (i32, i32) {
    %c0_i32 = arith.constant 0 : i32
    %c0_i32_0 = arith.constant 0 : i32
    %c0_i32_1 = arith.constant 0 : i32
    return %c0_i32, %c0_i32_0 : i32, i32
  }
  func.func @transform_2(%arg0: i32, %arg1: i32) -> (i32, i32) {
    %c0_i32 = arith.constant 0 : i32
    %c0_i32_0 = arith.constant 0 : i32
    %c0_i32_1 = arith.constant 0 : i32
    return %c0_i32, %c0_i32_0 : i32, i32
  }
  func.func @transform_3(%arg0: i32, %arg1: i32) -> (i32, i32) {
    %c0_i32 = arith.constant 0 : i32
    %c0_i32_0 = arith.constant 0 : i32
    %c0_i32_1 = arith.constant 0 : i32
    return %c0_i32, %c0_i32_0 : i32, i32
  }
  func.func @transform_4(%arg0: i32, %arg1: i32) -> (i32, i32) {
    %c0_i32 = arith.constant 0 : i32
    %c0_i32_0 = arith.constant 0 : i32
    %c0_i32_1 = arith.constant 0 : i32
    return %c0_i32, %c0_i32_0 : i32, i32
  }
  func.func @transform_5(%arg0: i32, %arg1: i32) -> (i32, i32, i32) {
    %c0_i32 = arith.constant 0 : i32
    %c0_i32_0 = arith.constant 0 : i32
    %c0_i32_1 = arith.constant 0 : i32
    return %arg0, %c0_i32, %c0_i32_0 : i32, i32, i32
  }
  func.func @transform_6(%arg0: i32, %arg1: i32) -> (i32, i32, i32) {
    %c0_i32 = arith.constant 0 : i32
    %c0_i32_0 = arith.constant 0 : i32
    %c0_i32_1 = arith.constant 0 : i32
    return %arg0, %c0_i32, %c0_i32_0 : i32, i32, i32
  }
  func.func @transform_7(%arg0: i32, %arg1: i32) -> (i32, i32, i32) {
    %c0_i32 = arith.constant 0 : i32
    %c0_i32_0 = arith.constant 0 : i32
    %c0_i32_1 = arith.constant 0 : i32
    return %arg0, %c0_i32, %c0_i32_0 : i32, i32, i32
  }
}

</mosaic_0001>

<bundles_post_ra>
// kernel: tpu_custom_call.1
= control target key start
LH: loop header
LB: loop body
LE: loop exit
PB: predicated region body
PF: predicated region fallthrough
CT: control target
= control target key end

     0   :  { %14 = vsyncpa [#allocation7], 0  ;;  %s569_s0 = inlined_call_operand.hbm [shape: f32[8,32], index: 0, kind: input, shape index: {}]   ;;  %s570_s1 = inlined_call_operand.hbm [shape: bf16[32,128], index: 1, kind: input, shape index: {}]   ;;  %s571_s2 = inlined_call_operand.vmem [shape: f32[1,128], index: 2, kind: input, shape index: {}]   ;;  %s572_s3 = inlined_call_operand.vmem [shape: f32[1,128], index: 3, kind: input, shape index: {}]   ;;  %s573_s4 = inlined_call_operand.<no memory space> [shape: f32[1,1], index: 4, kind: input, shape index: {}]   ;;  %s574_s5 = inlined_call_operand.hbm [shape: f32[1,1,32], index: 5, kind: output, shape index: {0}]   ;;  %s575_s6 = inlined_call_operand.hbm [shape: f32[1,1,1], index: 6, kind: output, shape index: {1}]   ;;  %s576_s7 = inlined_call_operand.hbm [shape: f32[1,1,1], index: 7, kind: output, shape index: {2}]  }
   0x1   :  { %15 = vsyncpa [#allocation10], 0 }
   0x2   :  { %16 = vsyncpa [#allocation8], 0 }
   0x3   :  { %17 = vsyncpa [#allocation13], 0  ;;  %s419_s24 = smov [#allocation6]   ;;  %s420_s26 = smov [#allocation9]  }
   0x4   :  { %s27_s25 = sshll.u32 %s419_s24, 4  ;;  %s36_s27 = sshll.u32 %s420_s26, 4  ;;  %s28_s25 = int_to_ptr.vmem [resolvable:$true] %s27_s25  ;;  %s470_s27 = int_to_ptr.vmem [resolvable:$true] %s36_s27 }
   0x5   :  { %s301_s30 = scalar_lea.hbm %s569_s0, 128 }
   0x6   :  { %p302_p0 = scmp.ne.s32.totalorder %s569_s0, %s301_s30  ;;  %p305_p1 = scmp.lt.u32.totalorder %s301_s30, %s569_s0 }
   0x8   :  { %p307_p2 = pnand %p305_p1, %p302_p0 }
   0xa   :  { %310 = shalt.err (!%p307_p2)
}
   0xb   :  { %s311_s12 = scalar_lea.vmem %s28_s25, 128  ;;  %p316_p4 = scmp.lt.s32.totalorder %s28_s25, %s28_s25 }
   0xc   :  { %p312_p3 = scmp.ne.s32.totalorder %s28_s25, %s311_s12  ;;  %p317_p5 = scmp.lt.s32.totalorder %s311_s12, %s311_s12 }
   0xe   :  { %p318_p6 = por %p317_p5, %p316_p4 }
  0x10   :  { %p319_p7 = pnand %p318_p6, %p312_p3 }
  0x12   :  { %322 = shalt.err (!%p319_p7)
}
  0x13   :  { %30 = dma.hbm_to_vmem [thread:$0]  %s569_s0, 128, %s28_s25, [#allocation7]  }
  0x14   :  { %s323_s17 = scalar_lea.hbm %s570_s1, 256 }
  0x15   :  { %p324_p8 = scmp.ne.s32.totalorder %s570_s1, %s323_s17  ;;  %p327_p9 = scmp.lt.u32.totalorder %s323_s17, %s570_s1 }
  0x17   :  { %p329_p10 = pnand %p327_p9, %p324_p8 }
  0x19   :  { %332 = shalt.err (!%p329_p10)
}
  0x1a   :  { %s333_s22 = scalar_lea.vmem %s470_s27, 256  ;;  %p338_p12 = scmp.lt.s32.totalorder %s470_s27, %s470_s27 }
  0x1b   :  { %p334_p11 = scmp.ne.s32.totalorder %s470_s27, %s333_s22  ;;  %p339_p13 = scmp.lt.s32.totalorder %s333_s22, %s333_s22 }
  0x1d   :  { %p340_p0 = por %p339_p13, %p338_p12 }
  0x1f   :  { %p341_p1 = pnand %p340_p0, %p334_p11 }
  0x21   :  { %344 = shalt.err (!%p341_p1)
}
  0x22   :  { %s421_s0 = smov 64   ;;  %s422_s23 = smov 4  }
  0x23   :  { %42 = dma.hbm_to_vmem [thread:$0]  %s570_s1, 256, %s470_s27, [#allocation10], %s421_s0, %s421_s0, %s422_s23  }
  0x24   :  { %411 = dma.done.wait [#allocation7], 128  }
  0x25   :  { %412 = vsyncadd [#allocation7], 4294967168 }
  0x26   :  { %413 = dma.done.wait [#allocation10], 256  }
  0x27   :  { %414 = vsyncadd [#allocation10], 4294967040  ;;  %vm61_vm0 = vcmask 0   ;;  %v423_v0 = vmov 0.0   ;;  %vm424_vm1 = vmmov 0   ;;  %v293_v1 = vld [vmem:[#allocation9] sm:$0xff]   ;;  %v147_v16 = vstv %s573_s4 }
  0x28   :  { %63 = vst.msk [vmem:[#allocation3] sm:$0x1] %vm61_vm0, %v423_v0  ;;  %272 = vmatprep.subr.bf16.mxu0 %v423_v0  ;;  %276 = vmatprep.mubr.msk.bf16.mxu0 %vm424_vm1, %v423_v0  ;;  %v294_v2 = vld [vmem:[#allocation9 + $0x8] sm:$0xff]   ;;  %v502_v3 = vld [vmem:[#allocation6] sm:$0xff]  ;;  %vm91_vm2 = vcmask 261120   ;;  %v425_v5 = vmov -inf   ;;  %v163_v21 = vlaneseq }
  0x29   :  { %273 = vmatpush3.bf16.msra.mxu0 %v293_v1  ;;  %v67_v4 = vpack.c.bf16 %v502_v3, %v502_v3  ;;  %62 = vst.msk [vmem:[#allocation2] sm:$0x1] %vm61_vm0, %v425_v5  ;;  %v264_v6 = vld [vmem:[%s571_s2] ss:$0 sm:$0xff]  ;;  %v426_v15 = vmov 0   ;;  %vm64_vm3 = vcmask 253952  }
  0x2a   :  { %274 = vmatprep.subr.bf16.mxu0 %v423_v0  ;;  %v268_v12 = vld [vmem:[%s572_s3] ss:$0 sm:$0xff]  ;;  %292 = vset.pattern.permute.xlu1 %v426_v15  ;;  %65 = vst.msk [vmem:[#allocation4] sm:$0x1] %vm64_vm3, %v423_v0  ;;  %v518_v24 = vshrl.u32 %v163_v21, 7  ;;  %vm173_vm5 = vcmask 7168  }
  0x2b   :  { %291 = vset.pattern.permute.xlu0 %v426_v15  ;;  %s427_s3 = smov [#allocation12]  }
  0x2c   :  { %v165_v28 = vsub.s32 0, %v518_v24  ;;  %s237_s4 = sshll.u32 %s427_s3, 4  ;;  %s238_s4 = int_to_ptr.vmem [resolvable:$true] %s237_s4 }
  0x2d   :  { %275 = vmatpush3.bf16.msra.mxu0 %v294_v2  ;;  %s345_s30 = scalar_lea.vmem %s238_s4, 16  ;;  %s349_s8 = scalar_lea.vmem %s238_s4, 32 }
  0x2e   :  { %p346_p2 = scmp.ne.s32.totalorder %s238_s4, %s345_s30  ;;  %p350_p3 = scmp.lt.s32.totalorder %s238_s4, %s238_s4 }
  0x2f   :  { %v171_v44 = vld [vmem:[#allocation3] sm:$0x1]  ;;  %p351_p4 = scmp.lt.s32.totalorder %s349_s8, %s345_s30 }
  0x30   :  { %277 = vmatmul.mubr.msk.bf16.vlgmr.msra.gmra.mrb[0].mxu0 %vm91_vm2, %v67_v4  ;;  %v149_v26 = vld [vmem:[#allocation2] sm:$0x1] }
  0x31   :  { %p352_p5 = por %p351_p4, %p350_p3 }
  0x33   :  { %p353_p6 = pnand %p352_p5, %p346_p2 }
 0x103   :  { %v129_v7 = vpop.f32.mrb[0].mxu0 }
 0x104   :  { %v130_v8 = vadd.f32 %v264_v6, %v129_v7  ;;  %v278_v9 = vpop.f32.mrb[1].mxu0 }
 0x105   :  { %v132_v10 = vpop.f32.mrb[2].mxu0 }
 0x106   :  { %295 = vtanh.f32 %v130_v8  ;;  %v279_v11 = vpop.f32.mrb[3].mxu0 }
 0x110   :  { %v296_v13 = vpop.eup %295 }
 0x111   :  { %v143_v14 = vmul.f32 %v296_v13, %v268_v12 }
 0x113   :  { %144 = vadd.xlane.f32.xlu0 %v143_v14 }
 0x1a0   :  { %v145_v17 = vpop.xlane.xlu0 %144 }
 0x1a1   :  { %v148_v18 = vadd.f32 %v147_v16, %v145_v17 }
 0x1a3   :  { %v150_v19 = vrot.slane %v148_v18, 4 }
 0x1a5   :  { %v151_v20 = vmax.f32 %v148_v18, %v150_v19 }
 0x1a7   :  { %v152_v22 = vrot.slane %v151_v20, 2 }
 0x1a9   :  { %v153_v23 = vmax.f32 %v151_v20, %v152_v22 }
 0x1ab   :  { %v154_v25 = vrot.slane %v153_v23, 1 }
 0x1ad   :  { %v155_v27 = vmax.f32 %v153_v23, %v154_v25 }
 0x1af   :  { %v156_v29 = vmax.f32 %v149_v26, %v155_v27 }
 0x1b1   :  { %vm157_vm4 = vcmp.eq.f32.partialorder %v156_v29, -inf  ;;  %211 = vst.msk [vmem:[#allocation2] sm:$0x1] %vm61_vm0, %v156_v29 }
 0x1b2   :  { %v158_v30 = vsel %vm157_vm4, 0.0, %v156_v29 }
 0x1b3   :  { %v159_v31 = vsub.f32 %v149_v26, %v158_v30  ;;  %v166_v32 = vrot.slane %v158_v30, %v165_v28 }
 0x1b5   :  { %v160_v33 = vmul.f32 1.442695, %v159_v31  ;;  %v168_v34 = vsub.f32 %v148_v18, %v166_v32 }
 0x1b7   :  { %297 = vpow2.f32 %v160_v33  ;;  %v169_v35 = vmul.f32 1.442695, %v168_v34 }
 0x1b8   :  { %v217_v36 = vld [vmem:[#allocation2] sm:$0x1] }
 0x1b9   :  { %299 = vpow2.f32 %v169_v35  ;;  %218 = vst.msk [vmem:[#allocation12] sm:$0x1] %vm61_vm0, %v217_v36 }
 0x1c1   :  { %v298_v37 = vpop.eup %297 }
 0x1c2   :  { %187 = vperm.xlu1 %292, %v298_v37   ;;  %v172_v46 = vmul.f32 %v298_v37, %v171_v44 }
 0x1c3   :  { %v300_v38 = vpop.eup %299 }
 0x1c4   :  { %v174_v39 = vsel %vm173_vm5, %v300_v38, 0.0  ;;  %197 = vperm.xlu0 %291, %v300_v38  }
 0x1c5   :  { %v175_v40 = vrot.slane %v174_v39, 4 }
 0x1c7   :  { %v176_v41 = vadd.f32 %v175_v40, %v174_v39 }
 0x1c9   :  { %v177_v42 = vrot.slane %v176_v41, 2 }
 0x1cb   :  { %v178_v43 = vadd.f32 %v177_v42, %v176_v41 }
 0x1cd   :  { %v179_v45 = vrot.slane %v178_v43, 1 }
 0x1cf   :  { %v180_v47 = vadd.f32 %v179_v45, %v178_v43 }
 0x1d1   :  { %v181_v48 = vadd.f32 %v180_v47, %v172_v46 }
 0x1d3   :  { %183 = vst.msk [vmem:[#allocation3] sm:$0x1] %vm61_vm0, %v181_v48 }
 0x1d4   :  { %356 = shalt.err (!%p353_p6)
}
 0x1d5   :  { %s357_s11 = scalar_lea.hbm %s575_s6, 16 }
 0x1d6   :  { %p358_p7 = scmp.ne.s32.totalorder %s575_s6, %s357_s11  ;;  %p361_p8 = scmp.lt.u32.totalorder %s357_s11, %s575_s6 }
 0x1d8   :  { %p363_p9 = pnand %p361_p8, %p358_p7 }
 0x1da   :  { %366 = shalt.err (!%p363_p9)
}
 0x1db   :  { %240 = dma.vmem_to_hbm [thread:$0]  %s238_s4, 16, %s575_s6, [#allocation13]   ;;  %v219_v49 = vld [vmem:[#allocation3] sm:$0x1] }
 0x1dc   :  { %220 = vst.msk [vmem:[#allocation14] sm:$0x1] %vm61_vm0, %v219_v49  ;;  %s428_s18 = smov [#allocation14]  }
 0x1dd   :  { %s247_s19 = sshll.u32 %s428_s18, 4  ;;  %s248_s19 = int_to_ptr.vmem [resolvable:$true] %s247_s19 }
 0x1de   :  { %s367_s20 = scalar_lea.vmem %s248_s19, 16  ;;  %s371_s21 = scalar_lea.vmem %s248_s19, 32 }
 0x1df   :  { %p368_p10 = scmp.ne.s32.totalorder %s248_s19, %s367_s20  ;;  %p372_p11 = scmp.lt.s32.totalorder %s248_s19, %s248_s19 }
 0x1e0   :  { %p373_p12 = scmp.lt.s32.totalorder %s371_s21, %s367_s20 }
 0x1e2   :  { %p374_p13 = por %p373_p12, %p372_p11 }
 0x1e4   :  { %p375_p0 = pnand %p374_p13, %p368_p10 }
 0x1e6   :  { %378 = shalt.err (!%p375_p0)
}
 0x1e7   :  { %s379_s23 = scalar_lea.hbm %s576_s7, 16 }
 0x1e8   :  { %p380_p1 = scmp.ne.s32.totalorder %s576_s7, %s379_s23  ;;  %p383_p2 = scmp.lt.u32.totalorder %s379_s23, %s576_s7 }
 0x1ea   :  { %p385_p3 = pnand %p383_p2, %p380_p1 }
 0x1ec   :  { %388 = shalt.err (!%p385_p3)
}
 0x1ed   :  { %250 = dma.vmem_to_hbm [thread:$0]  %s248_s19, 16, %s576_s7, [#allocation13]   ;;  %v184_v59 = vld [vmem:[#allocation4] sm:$0x1] }
 0x1ee   :  { %s429_s7 = smov [#allocation11]  }
 0x1ef   :  { %s227_s28 = sshll.u32 %s429_s7, 4  ;;  %s228_s28 = int_to_ptr.vmem [resolvable:$true] %s227_s28 }
 0x1f0   :  { %s389_s2 = scalar_lea.vmem %s228_s28, 16  ;;  %s393_s29 = scalar_lea.vmem %s228_s28, 32 }
 0x1f1   :  { %p390_p4 = scmp.ne.s32.totalorder %s228_s28, %s389_s2  ;;  %p394_p5 = scmp.lt.s32.totalorder %s228_s28, %s228_s28 }
 0x1f2   :  { %p395_p6 = scmp.lt.s32.totalorder %s393_s29, %s389_s2 }
 0x1f4   :  { %p396_p7 = por %p395_p6, %p394_p5 }
 0x1f6   :  { %p397_p8 = pnand %p396_p7, %p390_p4 }
 0x241   :  { %v188_v55 = vpop.permute.xlu1 %187 }
 0x242   :  { %v193_v57 = vrot.slane %v188_v55, %v165_v28 }
 0x243   :  { %v198_v50 = vpop.permute.xlu0 %197 }
 0x244   :  { %v200_v51 = vmul.f32 %v198_v50, %v502_v3  ;;  %v194_v61 = vmul.f32 %v193_v57, %v184_v59 }
 0x246   :  { %v201_v52 = vsel %vm91_vm2, %v200_v51, 0.0 }
 0x247   :  { %v202_v53 = vrot.slane %v201_v52, 4 }
 0x249   :  { %v203_v54 = vadd.f32 %v202_v53, %v201_v52 }
 0x24b   :  { %v204_v56 = vrot.slane %v203_v54, 2 }
 0x24d   :  { %v205_v58 = vadd.f32 %v204_v56, %v203_v54 }
 0x24f   :  { %v206_v60 = vrot.slane %v205_v58, 1 }
 0x251   :  { %v207_v62 = vadd.f32 %v206_v60, %v205_v58 }
 0x253   :  { %v208_v63 = vadd.f32 %v207_v62, %v194_v61 }
 0x255   :  { %210 = vst.msk [vmem:[#allocation4] sm:$0x1] %vm64_vm3, %v208_v63 }
 0x25c   :  { %v215_v0 = vld [vmem:[#allocation4] sm:$0x1] }
 0x25d   :  { %216 = vst.msk [vmem:[#allocation11] sm:$0x1] %vm64_vm3, %v215_v0 }
 0x25e   :  { %400 = shalt.err (!%p397_p8)
}
 0x25f   :  { %s401_s30 = scalar_lea.hbm %s574_s5, 16 }
 0x260   :  { %p402_p9 = scmp.ne.s32.totalorder %s574_s5, %s401_s30  ;;  %p405_p10 = scmp.lt.u32.totalorder %s401_s30, %s574_s5 }
 0x262   :  { %p407_p11 = pnand %p405_p10, %p402_p9 }
 0x264   :  { %410 = shalt.err (!%p407_p11)
}
 0x265   :  { %230 = dma.vmem_to_hbm [thread:$0]  %s228_s28, 16, %s574_s5, [#allocation8]  }
 0x266   :  { %415 = dma.done.wait [#allocation8], 16  }
 0x267   :  { %416 = vsyncadd [#allocation8], 4294967280 }
 0x268   :  { %417 = dma.done.wait [#allocation13], 32  }
 0x269   :  { %418 = vsyncadd [#allocation13], 4294967264 }
 0x26a   :  { %260 = vsyncpa [#allocation7], 1 }
 0x26b   :  { %261 = vsyncpa [#allocation10], 1 }
 0x26c   :  { %262 = vsyncpa [#allocation8], 1 }
 0x26d   :  { %263 = vsyncpa [#allocation13], 1 }

</bundles_post_ra>
